<compile_context>
chip_gen: v7x
topology: tpu7x:2x2x1
jax: 0.10.0
libtpu: 0.0.40
codegen_flags: <defaults>
</compile_context>

<pallas_src>
import functools

import jax
import jax.numpy as jnp
from jax.experimental import pallas as pl
from jax.experimental.pallas import tpu as pltpu


_NEG_BIG = -3.0e38  # large finite negative; exp() underflows to exactly 0.0


def _round_up(x, m):
    return ((x + m - 1) // m) * m


def _action_kernel(h_ref, w_ref, b_ref, o_ref):
    # h_ref: (Tb, D), w_ref: (D, O_pad), b_ref: (1, O_pad), o_ref: (Tb, O_pad)
    h = h_ref[...]
    w = w_ref[...]
    if h.dtype != w.dtype:
        h = h.astype(w.dtype)  # weight dtype chosen once at init (f32 or bf16)

    # fc: canonical (M,K)x(K,N) MXU matmul, f32 accumulation.
    logits = jnp.dot(h, w, preferred_element_type=jnp.float32)
    logits = logits + b_ref[...]  # padded class lanes carry -3e38 from init

    # Numerically stable log_softmax along the class dim, all in f32.
    m = jnp.max(logits, axis=-1, keepdims=True)
    z = logits - m
    lse = jnp.log(jnp.sum(jnp.exp(z), axis=-1, keepdims=True))
    o_ref[...] = (z - lse).astype(o_ref.dtype)


def prepare_action_params(weight, bias, *, matmul_dtype=None):
    """One-time (init) param prep: transpose, lane-pad, bake class mask.

    weight: (O, D) in nn.Linear layout; bias: (O,).
    Returns (w_pad (D, O_pad), b_pad (1, O_pad) f32, O).
    """
    O, D = weight.shape
    o_pad = _round_up(O, 128)

    w_dtype = matmul_dtype if matmul_dtype is not None else weight.dtype
    w_pad = jnp.zeros((D, o_pad), w_dtype)
    w_pad = w_pad.at[:, :O].set(weight.T.astype(w_dtype))

    # Padded weight columns are zero, so padded logits == bias lane == -3e38,
    # which contributes exp(-huge) == 0 to the normalizer: mask is free.
    b_pad = jnp.full((1, o_pad), _NEG_BIG, jnp.float32)
    b_pad = b_pad.at[0, :O].set(bias.astype(jnp.float32))
    return w_pad, b_pad, O


def action_network_forward(h_t, w_pad, b_pad, o_valid,
                           *, max_block_b=1024, slice_output=True):
    """h_t: (B, D); w_pad: (D, O_pad); b_pad: (1, O_pad).

    Returns (B, o_valid) f32 log-probabilities (or the padded (B_pad, O_pad)
    slab if slice_output=False; padded lanes are ~-3e38 and never win).
    """
    B, D = h_t.shape
    o_pad = w_pad.shape[1]

    if B <= max_block_b:
        # Single full-extent batch block: no per-call padding of h_t.
        block_b = B
        b_padded = B
        h_in = h_t
    else:
        block_b = max_block_b  # multiple of 8 (sublane aligned)
        b_padded = _round_up(B, block_b)
        h_in = jnp.pad(h_t, ((0, b_padded - B), (0, 0))) if b_padded != B else h_t

    out = pl.pallas_call(
        _action_kernel,
        out_shape=jax.ShapeDtypeStruct((b_padded, o_pad), jnp.float32),
        grid_spec=pltpu.PrefetchScalarGridSpec(
            num_scalar_prefetch=0,
            grid=(b_padded // block_b,),
            in_specs=[
                pl.BlockSpec((block_b, D), lambda i: (i, 0)),
                # Weight & bias stay VMEM-resident across all batch tiles.
                pl.BlockSpec((D, o_pad), lambda i: (0, 0)),
                pl.BlockSpec((1, o_pad), lambda i: (0, 0)),
            ],
            out_specs=pl.BlockSpec((block_b, o_pad), lambda i: (i, 0)),
        ),
        compiler_params=pltpu.CompilerParams(
            dimension_semantics=("parallel",),
        ),
    )(h_in, w_pad, b_pad)

    if slice_output:
        return out[:B, :o_valid]
    return out


if __name__ == "__main__":
    # Small shapes consistent with the module: hidden_size=32, num_classes=10, batch=2
    batch, input_size, output_size = 2, 32, 10

    key = jax.random.PRNGKey(0)
    k_h, k_w, k_b = jax.random.split(key, 3)

    # Deterministic synthetic parameters (mimicking nn.Linear's uniform init range)
    bound = 1.0 / (input_size ** 0.5)
    weight = jax.random.uniform(k_w, (output_size, input_size),
                                minval=-bound, maxval=bound, dtype=jnp.float32)
    bias = jax.random.uniform(k_b, (output_size,),
                              minval=-bound, maxval=bound, dtype=jnp.float32)
    h_t = jax.random.normal(k_h, (batch, input_size), dtype=jnp.float32)

    # One-time param prep ("at init"): transpose, pad, bake class mask.
    w_pad, b_pad, o_valid = prepare_action_params(weight, bias)

    fwd = jax.jit(functools.partial(action_network_forward, o_valid=o_valid))
    a_t = fwd(h_t, w_pad, b_pad)
    a_t = jax.block_until_ready(a_t)

    # Cross-check against a pure-JAX reference of the same forward pass
    ref = jax.nn.log_softmax(h_t @ weight.T + bias, axis=1)
    assert a_t.shape == (batch, output_size)
    assert jnp.allclose(a_t, ref, atol=1e-5, rtol=1e-5), "mismatch vs reference"

    print("KERNEL_OK")
</pallas_src>

<mosaic_0001>
module attributes {stable_mosaic.version = 11 : i64} {
  func.func @_action_kernel(%arg0: i32, %arg1: memref<2x32xf32, #tpu.memory_space<vmem>>, %arg2: memref<32x128xf32, #tpu.memory_space<vmem>>, %arg3: memref<1x128xf32, #tpu.memory_space<vmem>>, %arg4: memref<2x128xf32, #tpu.memory_space<vmem>>) attributes {dimension_semantics = [#tpu.dimension_semantics<parallel>], iteration_bounds = array<i64: 1>, scalar_prefetch = 0 : i64, scratch_operands = 0 : i64, tpu.core_type = #tpu.core_type<tc>, window_params = [{transform_indices = @transform_0, window_bounds = array<i64: 2, 32>}, {pipeline_mode = #tpu.pipeline_mode<synchronous>, transform_indices = @transform_1, window_bounds = array<i64: 32, 128>}, {pipeline_mode = #tpu.pipeline_mode<synchronous>, transform_indices = @transform_2, window_bounds = array<i64: 1, 128>}, {transform_indices = @transform_3, window_bounds = array<i64: 2, 128>}]} {
    %c0 = arith.constant 0 : index
    %c0_0 = arith.constant 0 : index
    %0 = vector.load %arg1[%c0, %c0_0] : memref<2x32xf32, #tpu.memory_space<vmem>>, vector<2x32xf32>
    %c0_1 = arith.constant 0 : index
    %c0_2 = arith.constant 0 : index
    %1 = vector.load %arg2[%c0_1, %c0_2] : memref<32x128xf32, #tpu.memory_space<vmem>>, vector<32x128xf32>
    %cst = arith.constant dense<0.000000e+00> : vector<2x128xf32>
    %2 = tpu.matmul %0, %1, %cst {dimension_numbers = #tpu.dot_dimension_numbers<[1], [0], [0], [1], [0, 0, 1, 1], [], []>} : vector<2x32xf32>, vector<32x128xf32>, vector<2x128xf32> -> vector<2x128xf32>
    %c0_3 = arith.constant 0 : index
    %c0_4 = arith.constant 0 : index
    %3 = vector.load %arg3[%c0_3, %c0_4] : memref<1x128xf32, #tpu.memory_space<vmem>>, vector<1x128xf32>
    %4 = vector.broadcast %3 : vector<1x128xf32> to vector<2x128xf32>
    %5 = arith.addf %2, %4 : vector<2x128xf32>
    %cst_5 = arith.constant dense<0xFF800000> : vector<2xf32>
    %6 = vector.multi_reduction <maximumf>, %5, %cst_5 [1] : vector<2x128xf32> to vector<2xf32>
    %7 = vector.shape_cast %6 : vector<2xf32> to vector<2x1xf32>
    %8 = vector.broadcast %7 : vector<2x1xf32> to vector<2x128xf32>
    %9 = arith.subf %5, %8 : vector<2x128xf32>
    %10 = math.exp %9 : vector<2x128xf32>
    %cst_6 = arith.constant dense<0.000000e+00> : vector<2xf32>
    %11 = vector.multi_reduction <add>, %10, %cst_6 [1] : vector<2x128xf32> to vector<2xf32>
    %12 = vector.shape_cast %11 : vector<2xf32> to vector<2x1xf32>
    %13 = math.log %12 : vector<2x1xf32>
    %14 = vector.broadcast %13 : vector<2x1xf32> to vector<2x128xf32>
    %15 = arith.subf %9, %14 : vector<2x128xf32>
    %c0_7 = arith.constant 0 : index
    %c0_8 = arith.constant 0 : index
    %16 = vector.load %arg4[%c0_7, %c0_8] : memref<2x128xf32, #tpu.memory_space<vmem>>, vector<2x128xf32>
    tpu.vector_store %arg4[%c0_7, %c0_8], %15 {strides = array<i32>} : memref<2x128xf32, #tpu.memory_space<vmem>>, vector<2x128xf32>,
    return
  }
  func.func @transform_0(%arg0: i32) -> (i32, i32) {
    %c0_i32 = arith.constant 0 : i32
    %c0_i32_0 = arith.constant 0 : i32
    return %arg0, %c0_i32 : i32, i32
  }
  func.func @transform_1(%arg0: i32) -> (i32, i32) {
    %c0_i32 = arith.constant 0 : i32
    %c0_i32_0 = arith.constant 0 : i32
    %c0_i32_1 = arith.constant 0 : i32
    return %c0_i32, %c0_i32_0 : i32, i32
  }
  func.func @transform_2(%arg0: i32) -> (i32, i32) {
    %c0_i32 = arith.constant 0 : i32
    %c0_i32_0 = arith.constant 0 : i32
    %c0_i32_1 = arith.constant 0 : i32
    return %c0_i32, %c0_i32_0 : i32, i32
  }
  func.func @transform_3(%arg0: i32) -> (i32, i32) {
    %c0_i32 = arith.constant 0 : i32
    %c0_i32_0 = arith.constant 0 : i32
    return %arg0, %c0_i32 : i32, i32
  }
}

</mosaic_0001>

<bundles_post_ra>
// kernel: action_network_forward.1
= control target key start
LH: loop header
LB: loop body
LE: loop exit
PB: predicated region body
PF: predicated region fallthrough
CT: control target
= control target key end

     0   :  { %8 = vsyncpa [#allocation3], 0  ;;  %s339_s0 = inlined_call_operand.hbm [shape: f32[2,32], index: 0, kind: input, shape index: {}]   ;;  %s340_s1 = inlined_call_operand.hbm [shape: f32[32,128], index: 1, kind: input, shape index: {}]   ;;  %s341_s2 = inlined_call_operand.vmem [shape: f32[1,128], index: 2, kind: input, shape index: {}]   ;;  %s342_s3 = inlined_call_operand.hbm [shape: f32[2,128], index: 3, kind: output, shape index: {}]  }
   0x1   :  { %9 = vsyncpa [#allocation6], 0 }
   0x2   :  { %10 = vsyncpa [#allocation4], 0  ;;  %s265_s12 = smov [#allocation2]   ;;  %s266_s14 = smov [#allocation5]  }
   0x3   :  { %s17_s13 = sshll.u32 %s265_s12, 4  ;;  %s26_s15 = sshll.u32 %s266_s14, 4  ;;  %s18_s13 = int_to_ptr.vmem [resolvable:$true] %s17_s13  ;;  %s293_s15 = int_to_ptr.vmem [resolvable:$true] %s26_s15 }
   0x4   :  { %s193_s18 = scalar_lea.hbm %s339_s0, 32 }
   0x5   :  { %p194_p0 = scmp.ne.s32.totalorder %s339_s0, %s193_s18  ;;  %p197_p1 = scmp.lt.u32.totalorder %s193_s18, %s339_s0 }
   0x7   :  { %p199_p2 = pnand %p197_p1, %p194_p0 }
   0x9   :  { %202 = shalt.err (!%p199_p2)
}
   0xa   :  { %s203_s23 = scalar_lea.vmem %s18_s13, 32  ;;  %p208_p4 = scmp.lt.s32.totalorder %s18_s13, %s18_s13 }
   0xb   :  { %p204_p3 = scmp.ne.s32.totalorder %s18_s13, %s203_s23  ;;  %p209_p5 = scmp.lt.s32.totalorder %s203_s23, %s203_s23 }
   0xd   :  { %p210_p6 = por %p209_p5, %p208_p4 }
   0xf   :  { %p211_p7 = pnand %p210_p6, %p204_p3 }
  0x11   :  { %214 = shalt.err (!%p211_p7)
}
  0x12   :  { %20 = dma.hbm_to_vmem [thread:$0]  %s339_s0, 32, %s18_s13, [#allocation3]  }
  0x13   :  { %s215_s28 = scalar_lea.hbm %s340_s1, 512 }
  0x14   :  { %p216_p8 = scmp.ne.s32.totalorder %s340_s1, %s215_s28  ;;  %p219_p9 = scmp.lt.u32.totalorder %s215_s28, %s340_s1 }
  0x16   :  { %p221_p10 = pnand %p219_p9, %p216_p8 }
  0x18   :  { %224 = shalt.err (!%p221_p10)
}
  0x19   :  { %s225_s6 = scalar_lea.vmem %s293_s15, 512  ;;  %p230_p12 = scmp.lt.s32.totalorder %s293_s15, %s293_s15 }
  0x1a   :  { %p226_p11 = scmp.ne.s32.totalorder %s293_s15, %s225_s6  ;;  %p231_p13 = scmp.lt.s32.totalorder %s225_s6, %s225_s6 }
  0x1c   :  { %p232_p0 = por %p231_p13, %p230_p12 }
  0x1e   :  { %p233_p1 = pnand %p232_p0, %p226_p11 }
  0x20   :  { %236 = shalt.err (!%p233_p1)
}
  0x21   :  { %s267_s0 = smov 128   ;;  %s268_s7 = smov 8  }
  0x22   :  { %32 = dma.hbm_to_vmem [thread:$0]  %s340_s1, 512, %s293_s15, [#allocation6], %s267_s0, %s267_s0, %s268_s7  }
  0x23   :  { %259 = dma.done.wait [#allocation3], 32  }
  0x24   :  { %260 = vsyncadd [#allocation3], 4294967264 }
  0x25   :  { %261 = dma.done.wait [#allocation6], 512  }
  0x26   :  { %262 = vsyncadd [#allocation6], 4294966784  ;;  %v269_v0 = vmov 0.0|0.0   ;;  %vm270_vm0 = vmmov 0   ;;  %v271_v1 = vmov 0.0   ;;  %v42_v2 = vld [vmem:[#allocation5] sm:$0xff] }
  0x27   :  { %175 = vmatprep.subr.bf16.mxu0 %v269_v0  ;;  %172 = vmatprep.mubr.msk.f32.mxu0 %vm270_vm0, %v271_v1  ;;  %v43_v3 = vld [vmem:[#allocation5 + $0x8] sm:$0xff]  ;;  %v44_v4 = vld [vmem:[#allocation5 + $0x10] sm:$0xff]  ;;  %v45_v6 = vld [vmem:[#allocation5 + $0x18] sm:$0xff]  ;;  %vm53_vm1 = vcmask 261120   ;;  %vm127_vm2 = vcmask 1041408   ;;  %s272_s11 = smov [#allocation7]  }
  0x28   :  { %v176_v5 = vpack.c.bf16 %v43_v3, %v42_v2  ;;  %v179_v7 = vpack.c.bf16 %v45_v6, %v44_v4  ;;  %v41_v8 = vld [vmem:[#allocation2] sm:$0x3]  ;;  %s147_s12 = sshll.u32 %s272_s11, 4  ;;  %s148_s12 = int_to_ptr.vmem [resolvable:$true] %s147_s12 }
  0x29   :  { %v157_v9 = vld [vmem:[%s341_s2] ss:$0 sm:$0xff]  ;;  %s237_s2 = scalar_lea.vmem %s148_s12, 32  ;;  %p242_p3 = scmp.lt.s32.totalorder %s148_s12, %s148_s12 }
  0x2a   :  { %177 = vmatpush3.bf16.msra.mxu0 %v176_v5  ;;  %p238_p2 = scmp.ne.s32.totalorder %s148_s12, %s237_s2  ;;  %p243_p4 = scmp.lt.s32.totalorder %s237_s2, %s237_s2 }
  0x2b   :  { %178 = vmatprep.subr.bf16.mxu0 %v269_v0 }
  0x2c   :  { %p244_p5 = por %p243_p4, %p242_p3 }
  0x2e   :  { %180 = vmatpush3.bf16.msra.mxu0 %v179_v7  ;;  %p245_p6 = pnand %p244_p5, %p238_p2 }
  0x31   :  { %173 = vmatmul.mubr.msk.f32.vlgmr.msra.gmra.mrb[0].mxu0 %vm53_vm1, %v41_v8 }
 0x104   :  { %v123_v10 = vpop.f32.mrb[0].mxu0 }
 0x105   :  { %v124_v11 = vadd.f32 %v157_v9, %v123_v10  ;;  %v174_v12 = vpop.f32.mrb[1].mxu0 }
 0x107   :  { %v128_v13 = vsel %vm127_vm2, %v124_v11, -inf }
 0x108   :  { %129 = vmax.xlane.f32.xlu0 %v128_v13 }
 0x195   :  { %v130_v14 = vpop.xlane.xlu0 %129 }
 0x196   :  { %v131_v15 = vsub.f32 %v124_v11, %v130_v14 }
 0x198   :  { %v132_v16 = vmul.f32 1.442695, %v131_v15 }
 0x19a   :  { %189 = vpow2.f32 %v132_v16 }
 0x1a4   :  { %v190_v17 = vpop.eup %189 }
 0x1a5   :  { %v134_v18 = vsel %vm127_vm2, %v190_v17, 0.0 }
 0x1a6   :  { %135 = vadd.xlane.f32.xlu0 %v134_v18 }
 0x233   :  { %v136_v19 = vpop.xlane.xlu0 %135 }
 0x234   :  { %191 = vlog2.f32 %v136_v19 }
 0x23e   :  { %v192_v20 = vpop.eup %191 }
 0x23f   :  { %v138_v21 = vmul.f32 0.6931472, %v192_v20 }
 0x241   :  { %v139_v22 = vsub.f32 %v131_v15, %v138_v21 }
 0x243   :  { %140 = vst [vmem:[#allocation7] sm:$0x3] %v139_v22 }
 0x244   :  { %248 = shalt.err (!%p245_p6)
}
 0x245   :  { %s249_s15 = scalar_lea.hbm %s342_s3, 32 }
 0x246   :  { %p250_p7 = scmp.ne.s32.totalorder %s342_s3, %s249_s15  ;;  %p253_p8 = scmp.lt.u32.totalorder %s249_s15, %s342_s3 }
 0x248   :  { %p255_p9 = pnand %p253_p8, %p250_p7 }
 0x24a   :  { %258 = shalt.err (!%p255_p9)
}
 0x24b   :  { %150 = dma.vmem_to_hbm [thread:$0]  %s148_s12, 32, %s342_s3, [#allocation4]  }
 0x24c   :  { %263 = dma.done.wait [#allocation4], 32  }
 0x24d   :  { %264 = vsyncadd [#allocation4], 4294967264 }
 0x24e   :  { %154 = vsyncpa [#allocation3], 1 }
 0x24f   :  { %155 = vsyncpa [#allocation6], 1 }
 0x250   :  { %156 = vsyncpa [#allocation4], 1 }

</bundles_post_ra>
